<compile_context>
chip_gen: v6e
topology: v6e:2x2x1
jax: 0.10.0
libtpu: 0.0.40
codegen_flags: <defaults>
</compile_context>

<pallas_src>
import functools

import jax
import jax.numpy as jnp
from jax.experimental import pallas as pl
from jax.experimental.pallas import tpu as pltpu


def _round_up(x, m):
    return pl.cdiv(x, m) * m


def _actor_kernel(x_ref, w1_ref, b1_ref, w2_ref, b2_ref, w3_ref, b3_ref, o_ref):
    """Full actor MLP for one batch tile: 3 matmuls + ReLU + stable softmax."""
    x = x_ref[...]  # bf16 (tile_b, in_pad)

    # fc1 + ReLU  (bf16 MXU inputs, f32 accumulation, f32 bias)
    h1 = jnp.dot(x, w1_ref[...], preferred_element_type=jnp.float32) + b1_ref[...]
    h1 = jnp.maximum(h1, 0.0).astype(jnp.bfloat16)

    # fc2 + ReLU
    h2 = jnp.dot(h1, w2_ref[...], preferred_element_type=jnp.float32) + b2_ref[...]
    h2 = jnp.maximum(h2, 0.0).astype(jnp.bfloat16)

    # fc3 (logits); padded action columns carry a -1e30 bias -> softmax prob 0.
    logits = jnp.dot(h2, w3_ref[...], preferred_element_type=jnp.float32) + b3_ref[...]

    # Numerically stable softmax over the action axis (dim=-1), f32 math.
    m = jnp.max(logits, axis=-1, keepdims=True)
    e = jnp.exp(logits - m)
    inv = pl.reciprocal(jnp.sum(e, axis=-1, keepdims=True), approx=True)
    o_ref[...] = (e * inv).astype(o_ref.dtype)


@functools.partial(jax.jit, static_argnames=("tile_b",))
def actor_forward(state, w1, b1, w2, b2, w3, b3, *, tile_b=128):
    """Actor MLP forward, tiled over the batch axis with a single fused kernel.

    Returns the categorical probabilities (the `probs` of the torch
    Categorical distribution the module's forward produces), in float32.
    """
    B, in_dim = state.shape
    fc1 = w1.shape[1]
    fc2 = w2.shape[1]
    n_actions = w3.shape[1]

    # Lane-dense padding of the small dims.
    in_pad = _round_up(in_dim, 128)
    act_pad = _round_up(n_actions, 128)

    # Batch tiling: cap the tile at the (16-rounded) batch, pad B to a multiple.
    tile = min(_round_up(tile_b, 16), _round_up(B, 16))
    b_pad = _round_up(B, tile)
    grid = (b_pad // tile,)

    # Pad / cast operands.  Zero padding of x columns / W1 rows / W3 columns is
    # mathematically inert; the -1e30 bias on padded action columns makes their
    # softmax probability exactly 0.
    x = jnp.zeros((b_pad, in_pad), jnp.bfloat16).at[:B, :in_dim].set(
        state.astype(jnp.bfloat16))
    w1p = jnp.zeros((in_pad, fc1), jnp.bfloat16).at[:in_dim, :].set(
        w1.astype(jnp.bfloat16))
    b1p = b1.reshape(1, fc1).astype(jnp.float32)
    w2p = w2.astype(jnp.bfloat16)
    b2p = b2.reshape(1, fc2).astype(jnp.float32)
    w3p = jnp.zeros((fc2, act_pad), jnp.bfloat16).at[:, :n_actions].set(
        w3.astype(jnp.bfloat16))
    b3p = jnp.full((1, act_pad), -1e30, jnp.float32).at[0, :n_actions].set(
        b3.reshape(-1).astype(jnp.float32))

    flops = 2 * b_pad * (in_pad * fc1 + fc1 * fc2 + fc2 * act_pad)
    bytes_accessed = (
        x.size * 2 + w1p.size * 2 + w2p.size * 2 + w3p.size * 2
        + (b1p.size + b2p.size + b3p.size) * 4
        + b_pad * act_pad * 4
    )
    cost = pl.CostEstimate(
        flops=int(flops),
        transcendentals=int(b_pad * act_pad),
        bytes_accessed=int(bytes_accessed),
    )

    out = pl.pallas_call(
        _actor_kernel,
        out_shape=jax.ShapeDtypeStruct((b_pad, act_pad), jnp.float32),
        grid_spec=pltpu.PrefetchScalarGridSpec(
            num_scalar_prefetch=0,
            grid=grid,
            in_specs=[
                pl.BlockSpec((tile, in_pad), lambda i: (i, 0)),   # x tile
                pl.BlockSpec((in_pad, fc1), lambda i: (0, 0)),    # W1 (constant)
                pl.BlockSpec((1, fc1), lambda i: (0, 0)),         # b1
                pl.BlockSpec((fc1, fc2), lambda i: (0, 0)),       # W2
                pl.BlockSpec((1, fc2), lambda i: (0, 0)),         # b2
                pl.BlockSpec((fc2, act_pad), lambda i: (0, 0)),   # W3 (padded)
                pl.BlockSpec((1, act_pad), lambda i: (0, 0)),     # b3 (padded)
            ],
            out_specs=pl.BlockSpec((tile, act_pad), lambda i: (i, 0)),
        ),
        compiler_params=pltpu.CompilerParams(
            dimension_semantics=("parallel",),
        ),
        cost_estimate=cost,
    )(x, w1p, b1p, w2p, b2p, w3p, b3p)

    return out[:B, :n_actions]


def init_actor_params(key, input_dim, n_actions, fc1_dims=256, fc2_dims=256):
    """Deterministic init matching nn.Linear default (U(-1/sqrt(fan_in), +)).

    Weights are stored bf16 (MXU-native), biases f32.
    """
    ks = jax.random.split(key, 6)

    def linear(kw, kb, fan_in, fan_out):
        bound = 1.0 / jnp.sqrt(fan_in)
        w = jax.random.uniform(kw, (fan_in, fan_out), jnp.float32, -bound, bound)
        b = jax.random.uniform(kb, (1, fan_out), jnp.float32, -bound, bound)
        return w.astype(jnp.bfloat16), b

    w1, b1 = linear(ks[0], ks[1], input_dim, fc1_dims)
    w2, b2 = linear(ks[2], ks[3], fc1_dims, fc2_dims)
    w3, b3 = linear(ks[4], ks[5], fc2_dims, n_actions)
    return w1, b1, w2, b2, w3, b3


if __name__ == "__main__":
    # Small shapes consistent with the module: state = (batch, input_dims)
    batch = 8
    input_dim = 32
    n_actions = 8
    fc1_dims = 256
    fc2_dims = 256

    key = jax.random.PRNGKey(0)
    k_state, k_params = jax.random.split(key)

    state = jax.random.normal(k_state, (batch, input_dim), jnp.float32)
    params = init_actor_params(k_params, input_dim, n_actions, fc1_dims, fc2_dims)

    probs = actor_forward(state, *params)
    probs = jax.block_until_ready(probs)

    # Pure-JAX reference with identical bf16-compute / f32-accumulate semantics.
    w1, b1, w2, b2, w3, b3 = params
    xb = state.astype(jnp.bfloat16)
    h1 = jnp.maximum(jnp.dot(xb, w1, preferred_element_type=jnp.float32) + b1, 0.0)
    h1 = h1.astype(jnp.bfloat16)
    h2 = jnp.maximum(jnp.dot(h1, w2, preferred_element_type=jnp.float32) + b2, 0.0)
    h2 = h2.astype(jnp.bfloat16)
    ref = jax.nn.softmax(
        jnp.dot(h2, w3, preferred_element_type=jnp.float32) + b3, axis=-1)

    assert probs.shape == (batch, n_actions)
    assert probs.dtype == jnp.float32
    assert jnp.allclose(probs, ref, atol=2e-2, rtol=2e-2), \
        float(jnp.max(jnp.abs(probs - ref)))
    assert jnp.allclose(jnp.sum(probs, axis=-1), 1.0, atol=2e-2)

    # TODO(synk): torch.distributions.Categorical sampling/log_prob is host-side
    # glue, not a kernel op; the kernel produces the distribution's `probs`.
    print("KERNEL_OK")
</pallas_src>

<mosaic_0001>
module attributes {stable_mosaic.version = 11 : i64} {
  func.func @_actor_kernel(%arg0: i32, %arg1: memref<16x128xbf16, #tpu.memory_space<vmem>>, %arg2: memref<128x256xbf16, #tpu.memory_space<vmem>>, %arg3: memref<1x256xf32, #tpu.memory_space<vmem>>, %arg4: memref<256x256xbf16, #tpu.memory_space<vmem>>, %arg5: memref<1x256xf32, #tpu.memory_space<vmem>>, %arg6: memref<256x128xbf16, #tpu.memory_space<vmem>>, %arg7: memref<1x128xf32, #tpu.memory_space<vmem>>, %arg8: memref<16x128xf32, #tpu.memory_space<vmem>>) attributes {dimension_semantics = [#tpu.dimension_semantics<parallel>], iteration_bounds = array<i64: 1>, scalar_prefetch = 0 : i64, scratch_operands = 0 : i64, tpu.core_type = #tpu.core_type<tc>, window_params = [{transform_indices = @transform_0, window_bounds = array<i64: 16, 128>}, {pipeline_mode = #tpu.pipeline_mode<synchronous>, transform_indices = @transform_1, window_bounds = array<i64: 128, 256>}, {pipeline_mode = #tpu.pipeline_mode<synchronous>, transform_indices = @transform_2, window_bounds = array<i64: 1, 256>}, {pipeline_mode = #tpu.pipeline_mode<synchronous>, transform_indices = @transform_3, window_bounds = array<i64: 256, 256>}, {pipeline_mode = #tpu.pipeline_mode<synchronous>, transform_indices = @transform_4, window_bounds = array<i64: 1, 256>}, {pipeline_mode = #tpu.pipeline_mode<synchronous>, transform_indices = @transform_5, window_bounds = array<i64: 256, 128>}, {pipeline_mode = #tpu.pipeline_mode<synchronous>, transform_indices = @transform_6, window_bounds = array<i64: 1, 128>}, {transform_indices = @transform_7, window_bounds = array<i64: 16, 128>}]} {
    %c0 = arith.constant 0 : index
    %c0_0 = arith.constant 0 : index
    %0 = vector.load %arg1[%c0, %c0_0] : memref<16x128xbf16, #tpu.memory_space<vmem>>, vector<16x128xbf16>
    %c0_1 = arith.constant 0 : index
    %c0_2 = arith.constant 0 : index
    %1 = vector.load %arg2[%c0_1, %c0_2] : memref<128x256xbf16, #tpu.memory_space<vmem>>, vector<128x256xbf16>
    %cst = arith.constant dense<0.000000e+00> : vector<16x256xf32>
    %2 = tpu.matmul %0, %1, %cst {dimension_numbers = #tpu.dot_dimension_numbers<[1], [0], [0], [1], [0, 0, 1, 1], [], []>} : vector<16x128xbf16>, vector<128x256xbf16>, vector<16x256xf32> -> vector<16x256xf32>
    %c0_3 = arith.constant 0 : index
    %c0_4 = arith.constant 0 : index
    %3 = vector.load %arg3[%c0_3, %c0_4] : memref<1x256xf32, #tpu.memory_space<vmem>>, vector<1x256xf32>
    %4 = vector.broadcast %3 : vector<1x256xf32> to vector<16x256xf32>
    %5 = arith.addf %2, %4 : vector<16x256xf32>
    %cst_5 = arith.constant 0.000000e+00 : f32
    %6 = vector.broadcast %cst_5 : f32 to vector<16x256xf32>
    %7 = arith.maximumf %5, %6 : vector<16x256xf32>
    %8 = arith.truncf %7 : vector<16x256xf32> to vector<16x256xbf16>
    %c0_6 = arith.constant 0 : index
    %c0_7 = arith.constant 0 : index
    %9 = vector.load %arg4[%c0_6, %c0_7] : memref<256x256xbf16, #tpu.memory_space<vmem>>, vector<256x256xbf16>
    %cst_8 = arith.constant dense<0.000000e+00> : vector<16x256xf32>
    %10 = tpu.matmul %8, %9, %cst_8 {dimension_numbers = #tpu.dot_dimension_numbers<[1], [0], [0], [1], [0, 0, 1, 1], [], []>} : vector<16x256xbf16>, vector<256x256xbf16>, vector<16x256xf32> -> vector<16x256xf32>
    %c0_9 = arith.constant 0 : index
    %c0_10 = arith.constant 0 : index
    %11 = vector.load %arg5[%c0_9, %c0_10] : memref<1x256xf32, #tpu.memory_space<vmem>>, vector<1x256xf32>
    %12 = vector.broadcast %11 : vector<1x256xf32> to vector<16x256xf32>
    %13 = arith.addf %10, %12 : vector<16x256xf32>
    %cst_11 = arith.constant 0.000000e+00 : f32
    %14 = vector.broadcast %cst_11 : f32 to vector<16x256xf32>
    %15 = arith.maximumf %13, %14 : vector<16x256xf32>
    %16 = arith.truncf %15 : vector<16x256xf32> to vector<16x256xbf16>
    %c0_12 = arith.constant 0 : index
    %c0_13 = arith.constant 0 : index
    %17 = vector.load %arg6[%c0_12, %c0_13] : memref<256x128xbf16, #tpu.memory_space<vmem>>, vector<256x128xbf16>
    %cst_14 = arith.constant dense<0.000000e+00> : vector<16x128xf32>
    %18 = tpu.matmul %16, %17, %cst_14 {dimension_numbers = #tpu.dot_dimension_numbers<[1], [0], [0], [1], [0, 0, 1, 1], [], []>} : vector<16x256xbf16>, vector<256x128xbf16>, vector<16x128xf32> -> vector<16x128xf32>
    %c0_15 = arith.constant 0 : index
    %c0_16 = arith.constant 0 : index
    %19 = vector.load %arg7[%c0_15, %c0_16] : memref<1x128xf32, #tpu.memory_space<vmem>>, vector<1x128xf32>
    %20 = vector.broadcast %19 : vector<1x128xf32> to vector<16x128xf32>
    %21 = arith.addf %18, %20 : vector<16x128xf32>
    %cst_17 = arith.constant dense<0xFF800000> : vector<16xf32>
    %22 = vector.multi_reduction <maximumf>, %21, %cst_17 [1] : vector<16x128xf32> to vector<16xf32>
    %23 = vector.shape_cast %22 : vector<16xf32> to vector<16x1xf32>
    %24 = vector.broadcast %23 : vector<16x1xf32> to vector<16x128xf32>
    %25 = arith.subf %21, %24 : vector<16x128xf32>
    %26 = math.exp %25 : vector<16x128xf32>
    %cst_18 = arith.constant dense<0.000000e+00> : vector<16xf32>
    %27 = vector.multi_reduction <add>, %26, %cst_18 [1] : vector<16x128xf32> to vector<16xf32>
    %28 = vector.shape_cast %27 : vector<16xf32> to vector<16x1xf32>
    %29 = tpu.reciprocal %28 {approx = true} : vector<16x1xf32> -> vector<16x1xf32>
    %30 = vector.broadcast %29 : vector<16x1xf32> to vector<16x128xf32>
    %31 = arith.mulf %26, %30 : vector<16x128xf32>
    %c0_19 = arith.constant 0 : index
    %c0_20 = arith.constant 0 : index
    %32 = vector.load %arg8[%c0_19, %c0_20] : memref<16x128xf32, #tpu.memory_space<vmem>>, vector<16x128xf32>
    tpu.vector_store %arg8[%c0_19, %c0_20], %31 {strides = array<i32>} : memref<16x128xf32, #tpu.memory_space<vmem>>, vector<16x128xf32>,
    return
  }
  func.func @transform_0(%arg0: i32) -> (i32, i32) {
    %c0_i32 = arith.constant 0 : i32
    %c0_i32_0 = arith.constant 0 : i32
    return %arg0, %c0_i32 : i32, i32
  }
  func.func @transform_1(%arg0: i32) -> (i32, i32) {
    %c0_i32 = arith.constant 0 : i32
    %c0_i32_0 = arith.constant 0 : i32
    %c0_i32_1 = arith.constant 0 : i32
    return %c0_i32, %c0_i32_0 : i32, i32
  }
  func.func @transform_2(%arg0: i32) -> (i32, i32) {
    %c0_i32 = arith.constant 0 : i32
    %c0_i32_0 = arith.constant 0 : i32
    %c0_i32_1 = arith.constant 0 : i32
    return %c0_i32, %c0_i32_0 : i32, i32
  }
  func.func @transform_3(%arg0: i32) -> (i32, i32) {
    %c0_i32 = arith.constant 0 : i32
    %c0_i32_0 = arith.constant 0 : i32
    %c0_i32_1 = arith.constant 0 : i32
    return %c0_i32, %c0_i32_0 : i32, i32
  }
  func.func @transform_4(%arg0: i32) -> (i32, i32) {
    %c0_i32 = arith.constant 0 : i32
    %c0_i32_0 = arith.constant 0 : i32
    %c0_i32_1 = arith.constant 0 : i32
    return %c0_i32, %c0_i32_0 : i32, i32
  }
  func.func @transform_5(%arg0: i32) -> (i32, i32) {
    %c0_i32 = arith.constant 0 : i32
    %c0_i32_0 = arith.constant 0 : i32
    %c0_i32_1 = arith.constant 0 : i32
    return %c0_i32, %c0_i32_0 : i32, i32
  }
  func.func @transform_6(%arg0: i32) -> (i32, i32) {
    %c0_i32 = arith.constant 0 : i32
    %c0_i32_0 = arith.constant 0 : i32
    %c0_i32_1 = arith.constant 0 : i32
    return %c0_i32, %c0_i32_0 : i32, i32
  }
  func.func @transform_7(%arg0: i32) -> (i32, i32) {
    %c0_i32 = arith.constant 0 : i32
    %c0_i32_0 = arith.constant 0 : i32
    return %arg0, %c0_i32 : i32, i32
  }
}

</mosaic_0001>

<bundles_post_ra>
// kernel: actor_forward.1
= control target key start
LH: loop header
LB: loop body
LE: loop exit
PB: predicated region body
PF: predicated region fallthrough
CT: control target
= control target key end

     0   :  { %v831_v1 = vmov 0   ;;  %v47_v60 = vlaneseq  ;;  %s1082_s1 = inlined_call_operand.vmem [shape: bf16[128,256], index: 1, kind: input, shape index: {}]   ;;  %s1083_s0 = inlined_call_operand.vmem [shape: bf16[16,128], index: 0, kind: input, shape index: {}]   ;;  %s1084_s3 = inlined_call_operand.vmem [shape: bf16[256,256], index: 3, kind: input, shape index: {}]   ;;  %s1085_s5 = inlined_call_operand.vmem [shape: bf16[256,128], index: 5, kind: input, shape index: {}]   ;;  %s1086_s2 = inlined_call_operand.vmem [shape: f32[1,256], index: 2, kind: input, shape index: {}]   ;;  %s1087_s4 = inlined_call_operand.vmem [shape: f32[1,256], index: 4, kind: input, shape index: {}]   ;;  %s1088_s6 = inlined_call_operand.vmem [shape: f32[1,128], index: 6, kind: input, shape index: {}]   ;;  %s1089_s7 = inlined_call_operand.vmem [shape: f32[16,128], index: 7, kind: output, shape index: {}]  }
   0x1   :  { %v734_v0 = vld [vmem:[%s1082_s1 + $0x74] ss:$8 sps:$4 sm:$0xff]   ;;  %175 = vmatprep.mubr.bf16.mxu0 %v831_v1  ;;  %v736_v2 = vld [vmem:[%s1082_s1 + $0x70] ss:$8 sps:$4 sm:$0xff]   ;;  %v737_v3 = vld [vmem:[%s1082_s1 + $0x64] ss:$8 sps:$4 sm:$0xff]  }
   0x2   :  { %143 = vmatprep.subr.bf16.mxu0 %v734_v0  ;;  %v739_v4 = vld [vmem:[%s1082_s1 + $0x60] ss:$8 sps:$4 sm:$0xff]   ;;  %v740_v5 = vld [vmem:[%s1082_s1 + $0x54] ss:$8 sps:$4 sm:$0xff]   ;;  %v742_v6 = vld [vmem:[%s1082_s1 + $0x50] ss:$8 sps:$4 sm:$0xff]  }
   0x3   :  { %144 = vmatpush1.bf16.msra.mxu0 %v736_v2  ;;  %v743_v7 = vld [vmem:[%s1082_s1 + $0x44] ss:$8 sps:$4 sm:$0xff]   ;;  %v745_v8 = vld [vmem:[%s1082_s1 + $0x40] ss:$8 sps:$4 sm:$0xff]   ;;  %v746_v9 = vld [vmem:[%s1082_s1 + $0x34] ss:$8 sps:$4 sm:$0xff]  }
   0x4   :  { %145 = vmatprep.subr.bf16.mxu0 %v737_v3  ;;  %v759_v10 = vld [vmem:[%s1084_s3 + $0x74] ss:$8 sps:$4 sm:$0xff]   ;;  %v761_v11 = vld [vmem:[%s1084_s3 + $0x70] ss:$8 sps:$4 sm:$0xff]   ;;  %v762_v12 = vld [vmem:[%s1084_s3 + $0x64] ss:$8 sps:$4 sm:$0xff]  }
   0x5   :  { %396 = vmatprep.subr.bf16.mxu1 %v759_v10  ;;  %v748_v13 = vld [vmem:[%s1082_s1 + $0x30] ss:$8 sps:$4 sm:$0xff]   ;;  %v764_v14 = vld [vmem:[%s1084_s3 + $0x60] ss:$8 sps:$4 sm:$0xff]   ;;  %v749_v15 = vld [vmem:[%s1082_s1 + $0x24] ss:$8 sps:$4 sm:$0xff]  }
   0x6   :  { %397 = vmatpush1.bf16.msra.mxu1 %v761_v11  ;;  %v765_v16 = vld [vmem:[%s1084_s3 + $0x54] ss:$8 sps:$4 sm:$0xff]   ;;  %v751_v17 = vld [vmem:[%s1082_s1 + $0x20] ss:$8 sps:$4 sm:$0xff]   ;;  %v767_v18 = vld [vmem:[%s1084_s3 + $0x50] ss:$8 sps:$4 sm:$0xff]  }
   0x7   :  { %146 = vmatpush1.bf16.msra.mxu0 %v739_v4  ;;  %398 = vmatprep.subr.bf16.mxu1 %v762_v12  ;;  %v752_v19 = vld [vmem:[%s1082_s1 + $0x14] ss:$8 sps:$4 sm:$0xff]   ;;  %v768_v20 = vld [vmem:[%s1084_s3 + $0x44] ss:$8 sps:$4 sm:$0xff]   ;;  %v754_v21 = vld [vmem:[%s1082_s1 + $0x10] ss:$8 sps:$4 sm:$0xff]  }
   0x8   :  { %147 = vmatprep.subr.bf16.mxu0 %v740_v5  ;;  %v770_v22 = vld [vmem:[%s1084_s3 + $0x40] ss:$8 sps:$4 sm:$0xff]   ;;  %v755_v23 = vld [vmem:[%s1082_s1 + $0x4] ss:$8 sps:$4 sm:$0xff]   ;;  %v771_v24 = vld [vmem:[%s1084_s3 + $0x34] ss:$8 sps:$4 sm:$0xff]  }
   0x9   :  { %v757_v25 = vld [vmem:[%s1082_s1] ss:$8 sps:$4 sm:$0xff]   ;;  %v773_v26 = vld [vmem:[%s1084_s3 + $0x30] ss:$8 sps:$4 sm:$0xff]   ;;  %v774_v27 = vld [vmem:[%s1084_s3 + $0x24] ss:$8 sps:$4 sm:$0xff]  }
   0xa   :  { %399 = vmatpush1.bf16.msra.mxu1 %v764_v14  ;;  %v758_v28 = vld [vmem:[%s1083_s0] sm:$0xff]   ;;  %v777_v30 = vld [vmem:[%s1084_s3 + $0x14] ss:$8 sps:$4 sm:$0xff]   ;;  %v779_v31 = vld [vmem:[%s1084_s3 + $0x10] ss:$8 sps:$4 sm:$0xff]   ;;  %v48_v61 = vshrl.u32 %v47_v60, 7 }
   0xb   :  { %148 = vmatpush1.bf16.msra.mxu0 %v742_v6  ;;  %400 = vmatprep.subr.bf16.mxu1 %v765_v16  ;;  %v776_v29 = vld [vmem:[%s1084_s3 + $0x20] ss:$8 sps:$4 sm:$0xff]   ;;  %v780_v32 = vld [vmem:[%s1084_s3 + $0x4] ss:$8 sps:$4 sm:$0xff]   ;;  %v783_v34 = vld [vmem:[%s1084_s3 + $0xf4] ss:$8 sps:$4 sm:$0xff]  }
   0xc   :  { %149 = vmatprep.subr.bf16.mxu0 %v743_v7  ;;  %v782_v33 = vld [vmem:[%s1084_s3] ss:$8 sps:$4 sm:$0xff]   ;;  %v785_v35 = vld [vmem:[%s1084_s3 + $0xf0] ss:$8 sps:$4 sm:$0xff]   ;;  %v786_v36 = vld [vmem:[%s1084_s3 + $0xe4] ss:$8 sps:$4 sm:$0xff]  }
   0xd   :  { %v788_v37 = vld [vmem:[%s1084_s3 + $0xe0] ss:$8 sps:$4 sm:$0xff]   ;;  %v789_v38 = vld [vmem:[%s1084_s3 + $0xd4] ss:$8 sps:$4 sm:$0xff]   ;;  %v791_v39 = vld [vmem:[%s1084_s3 + $0xd0] ss:$8 sps:$4 sm:$0xff]  }
   0xe   :  { %401 = vmatpush1.bf16.msra.mxu1 %v767_v18  ;;  %v792_v40 = vld [vmem:[%s1084_s3 + $0xc4] ss:$8 sps:$4 sm:$0xff]   ;;  %v794_v41 = vld [vmem:[%s1084_s3 + $0xc0] ss:$8 sps:$4 sm:$0xff]   ;;  %v795_v42 = vld [vmem:[%s1084_s3 + $0xb4] ss:$8 sps:$4 sm:$0xff]  }
   0xf   :  { %150 = vmatpush1.bf16.msra.mxu0 %v745_v8  ;;  %402 = vmatprep.subr.bf16.mxu1 %v768_v20  ;;  %v797_v43 = vld [vmem:[%s1084_s3 + $0xb0] ss:$8 sps:$4 sm:$0xff]   ;;  %v798_v44 = vld [vmem:[%s1084_s3 + $0xa4] ss:$8 sps:$4 sm:$0xff]   ;;  %v800_v45 = vld [vmem:[%s1084_s3 + $0xa0] ss:$8 sps:$4 sm:$0xff]  }
  0x10   :  { %151 = vmatprep.subr.bf16.mxu0 %v746_v9  ;;  %v801_v46 = vld [vmem:[%s1084_s3 + $0x94] ss:$8 sps:$4 sm:$0xff]   ;;  %v803_v47 = vld [vmem:[%s1084_s3 + $0x90] ss:$8 sps:$4 sm:$0xff]   ;;  %v804_v48 = vld [vmem:[%s1084_s3 + $0x84] ss:$8 sps:$4 sm:$0xff]  }
  0x11   :  { %v806_v49 = vld [vmem:[%s1084_s3 + $0x80] ss:$8 sps:$4 sm:$0xff]   ;;  %v807_v50 = vld [vmem:[%s1085_s5 + $0x78] sm:$0xff]   ;;  %v809_v52 = vld [vmem:[%s1085_s5 + $0x70] sm:$0xff]   ;;  %v53_v62 = vsub.s32 1, %v48_v61  ;;  %v49_v63 = vsub.s32 0, %v48_v61 }
  0x12   :  { %403 = vmatpush1.bf16.msra.mxu1 %v770_v22  ;;  %v808_v51 = vld [vmem:[%s1085_s5 + $0x38] sm:$0xff]   ;;  %v810_v53 = vld [vmem:[%s1085_s5 + $0x30] sm:$0xff]   ;;  %v811_v54 = vld [vmem:[%s1085_s5 + $0x68] sm:$0xff]  }
  0x13   :  { %152 = vmatpush1.bf16.msra.mxu0 %v748_v13  ;;  %404 = vmatprep.subr.bf16.mxu1 %v771_v24  ;;  %v812_v55 = vld [vmem:[%s1085_s5 + $0x28] sm:$0xff]   ;;  %v813_v56 = vld [vmem:[%s1085_s5 + $0x60] sm:$0xff]   ;;  %v815_v58 = vld [vmem:[%s1085_s5 + $0x58] sm:$0xff]  }
  0x14   :  { %153 = vmatprep.subr.bf16.mxu0 %v749_v15  ;;  %v814_v57 = vld [vmem:[%s1085_s5 + $0x20] sm:$0xff]   ;;  %v816_v59 = vld [vmem:[%s1085_s5 + $0x18] sm:$0xff]   ;;  %v818_v18 = vld [vmem:[%s1085_s5 + $0x10] sm:$0xff]  }
  0x15   :  { %v45_v0 = vld [vmem:[%s1086_s2] sm:$0x3]  ;;  %v820_v20 = vld [vmem:[%s1085_s5 + $0x8] sm:$0xff]  }
  0x16   :  { %405 = vmatpush1.bf16.msra.mxu1 %v773_v26  ;;  %v54_v2 = vrot.slane %v45_v0, %v53_v62  ;;  %v50_v3 = vrot.slane %v45_v0, %v49_v63  ;;  %v822_v22 = vld [vmem:[%s1085_s5] sm:$0xff]  }
  0x17   :  { %154 = vmatpush1.bf16.msra.mxu0 %v751_v17  ;;  %406 = vmatprep.subr.bf16.mxu1 %v774_v27  ;;  %v817_v17 = vld [vmem:[%s1085_s5 + $0x50] sm:$0xff]  }
  0x18   :  { %155 = vmatprep.subr.bf16.mxu0 %v752_v19  ;;  %v819_v19 = vld [vmem:[%s1085_s5 + $0x48] sm:$0xff]  }
  0x1a   :  { %407 = vmatpush1.bf16.msra.mxu1 %v776_v29 }
  0x1b   :  { %156 = vmatpush1.bf16.msra.mxu0 %v754_v21  ;;  %408 = vmatprep.subr.bf16.mxu1 %v777_v30  ;;  %v821_v21 = vld [vmem:[%s1085_s5 + $0x40] sm:$0xff]  }
  0x1c   :  { %157 = vmatprep.subr.bf16.mxu0 %v755_v23  ;;  %v224_v23 = vld [vmem:[%s1087_s4] sm:$0x3] }
  0x1d   :  { %v229_v26 = vrot.slane %v224_v23, %v49_v63 }
  0x1e   :  { %409 = vmatpush1.bf16.msra.mxu1 %v779_v31 }
  0x1f   :  { %158 = vmatpush1.bf16.msra.mxu0 %v757_v25  ;;  %410 = vmatprep.subr.bf16.mxu1 %v780_v32  ;;  %v233_v25 = vrot.slane %v224_v23, %v53_v62 }
  0x20   :  { %711 = vmatprep.subr.bf16.mxu0 %v807_v50 }
  0x22   :  { %176 = vmatmul.mubr.bf16.vlgmr.msra.gmra.mxu0 %v758_v28  ;;  %411 = vmatpush1.bf16.msra.mxu1 %v782_v33 }
  0x23   :  { %412 = vmatprep.subr.bf16.mxu1 %v783_v34  ;;  %712 = vmatpush3.bf16.msra.mxu0 %v808_v51 }
  0x24   :  { %713 = vmatprep.subr.bf16.mxu0 %v809_v52 }
  0x26   :  { %413 = vmatpush2.bf16.msra.mxu1 %v785_v35 }
  0x27   :  { %414 = vmatprep.subr.bf16.mxu1 %v786_v36  ;;  %714 = vmatpush3.bf16.msra.mxu0 %v810_v53 }
  0x28   :  { %715 = vmatprep.subr.bf16.mxu0 %v811_v54 }
  0x2a   :  { %415 = vmatpush2.bf16.msra.mxu1 %v788_v37 }
  0x2b   :  { %416 = vmatprep.subr.bf16.mxu1 %v789_v38  ;;  %716 = vmatpush3.bf16.msra.mxu0 %v812_v55 }
  0x2c   :  { %717 = vmatprep.subr.bf16.mxu0 %v813_v56 }
  0x2e   :  { %417 = vmatpush2.bf16.msra.mxu1 %v791_v39 }
  0x2f   :  { %418 = vmatprep.subr.bf16.mxu1 %v792_v40  ;;  %718 = vmatpush3.bf16.msra.mxu0 %v814_v57 }
  0x30   :  { %719 = vmatprep.subr.bf16.mxu0 %v815_v58 }
  0x32   :  { %419 = vmatpush2.bf16.msra.mxu1 %v794_v41 }
  0x33   :  { %420 = vmatprep.subr.bf16.mxu1 %v795_v42  ;;  %720 = vmatpush3.bf16.msra.mxu0 %v816_v59  ;;  %v694_v42 = vld [vmem:[%s1088_s6] ss:$0 sm:$0xff] }
  0x34   :  { %721 = vmatprep.subr.bf16.mxu0 %v817_v17 }
  0x36   :  { %421 = vmatpush2.bf16.msra.mxu1 %v797_v43 }
  0x37   :  { %422 = vmatprep.subr.bf16.mxu1 %v798_v44  ;;  %722 = vmatpush3.bf16.msra.mxu0 %v818_v18 }
  0x38   :  { %723 = vmatprep.subr.bf16.mxu0 %v819_v19 }
  0x3a   :  { %423 = vmatpush2.bf16.msra.mxu1 %v800_v45 }
  0x3b   :  { %424 = vmatprep.subr.bf16.mxu1 %v801_v46  ;;  %724 = vmatpush3.bf16.msra.mxu0 %v820_v20 }
  0x3c   :  { %725 = vmatprep.subr.bf16.mxu0 %v821_v21 }
  0x3e   :  { %425 = vmatpush2.bf16.msra.mxu1 %v803_v47 }
  0x3f   :  { %426 = vmatprep.subr.bf16.mxu1 %v804_v48  ;;  %726 = vmatpush3.bf16.msra.mxu0 %v822_v22 }
  0x42   :  { %427 = vmatpush2.bf16.msra.mxu1 %v806_v49 }
  0xe2   :  { %v177_v1 = vpop.f32.mrf.mxu0 }
  0xe3   :  { %v178_v8 = vadd.f32 %v177_v1, %v50_v3 }
  0xe4   :  { %v179_v4 = vpop.f32.mrf.mxu0 }
  0xe5   :  { %v180_v6 = vadd.f32 %v179_v4, %v54_v2  ;;  %v186_v14 = vmax.f32 %v178_v8, 0.0 }
  0xe6   :  { %v181_v5 = vpop.f32.mrf.mxu0 }
  0xe7   :  { %v182_v7 = vadd.f32 %v181_v5, %v50_v3  ;;  %v187_v12 = vmax.f32 %v180_v6, 0.0 }
  0xe8   :  { %v183_v9 = vpop.f32.mrf.mxu0 }
  0xe9   :  { %v184_v10 = vadd.f32 %v183_v9, %v54_v2  ;;  %v188_v11 = vmax.f32 %v182_v7, 0.0 }
  0xeb   :  { %v189_v13 = vmax.f32 %v184_v10, 0.0  ;;  %v190_v16 = vpack.c.bf16 %v188_v11, %v186_v14 }
  0xed   :  { %v191_v15 = vpack.c.bf16 %v189_v13, %v187_v12 }
  0xef   :  { %428 = vmatprep.mubr.bf16.mxu1 %v191_v15 }
  0xf0   :  { %429 = vmatmul.mubr.bf16.vlgmr.msra.gmra.mxu1 %v190_v16 }
 0x1b0   :  { %v430_v24 = vpop.f32.mrf.mxu1 }
 0x1b1   :  { %v431_v31 = vadd.f32 %v430_v24, %v229_v26 }
 0x1b2   :  { %v432_v27 = vpop.f32.mrf.mxu1 }
 0x1b3   :  { %v433_v29 = vadd.f32 %v432_v27, %v233_v25  ;;  %v439_v37 = vmax.f32 %v431_v31, 0.0 }
 0x1b4   :  { %v434_v28 = vpop.f32.mrf.mxu1 }
 0x1b5   :  { %v435_v30 = vadd.f32 %v434_v28, %v229_v26  ;;  %v440_v35 = vmax.f32 %v433_v29, 0.0 }
 0x1b6   :  { %v436_v32 = vpop.f32.mrf.mxu1 }
 0x1b7   :  { %v437_v33 = vadd.f32 %v436_v32, %v233_v25  ;;  %v441_v34 = vmax.f32 %v435_v30, 0.0 }
 0x1b9   :  { %v442_v36 = vmax.f32 %v437_v33, 0.0  ;;  %v443_v39 = vpack.c.bf16 %v441_v34, %v439_v37 }
 0x1bb   :  { %v444_v38 = vpack.c.bf16 %v442_v36, %v440_v35 }
 0x1bd   :  { %612 = vmatprep.mubr.bf16.mxu0 %v444_v38 }
 0x1be   :  { %613 = vmatmul.mubr.bf16.vlgmr.msra.gmra.mxu0 %v443_v39 }
 0x27e   :  { %v727_v40 = vpop.f32.mrf.mxu0 }
 0x280   :  { %v728_v41 = vpop.f32.mrf.mxu0 }
 0x281   :  { %v729_v43 = vadd.f32 %v728_v41, %v727_v40 }
 0x282   :  { %v730_v44 = vpop.f32.mrf.mxu0 }
 0x283   :  { %v615_v45 = vadd.f32 %v729_v43, %v694_v42 }
 0x284   :  { %v731_v46 = vpop.f32.mrf.mxu0 }
 0x285   :  { %v732_v47 = vadd.f32 %v731_v46, %v730_v44  ;;  %621 = vmax.xlane.f32.xlu0 %v615_v45 }
 0x287   :  { %v618_v48 = vadd.f32 %v732_v47, %v694_v42 }
 0x289   :  { %623 = vmax.xlane.f32.xlu0 %v618_v48 }
 0x30e   :  { %v622_v49 = vpop.xlane.xlu0 %621 }
 0x30f   :  { %v625_v50 = vsub.f32 %v615_v45, %v622_v49 }
 0x311   :  { %v627_v51 = vmul.f32 1.442695, %v625_v50 }
 0x312   :  { %v624_v52 = vpop.xlane.xlu0 %623 }
 0x313   :  { %823 = vpow2.f32 %v627_v51  ;;  %v626_v53 = vsub.f32 %v618_v48, %v624_v52 }
 0x315   :  { %v629_v54 = vmul.f32 1.442695, %v626_v53 }
 0x317   :  { %825 = vpow2.f32 %v629_v54 }
 0x320   :  { %v824_v55 = vpop.eup %823 }
 0x321   :  { %631 = vadd.xlane.f32.xlu1 %v824_v55 }
 0x324   :  { %v826_v56 = vpop.eup %825 }
 0x325   :  { %633 = vadd.xlane.f32.xlu1 %v826_v56 }
 0x3aa   :  { %v632_v57 = vpop.xlane.xlu1 %631 }
 0x3ab   :  { %827 = vrcp.f32 %v632_v57 }
 0x3ae   :  { %v634_v58 = vpop.xlane.xlu1 %633 }
 0x3af   :  { %829 = vrcp.f32 %v634_v58 }
 0x3b8   :  { %v828_v59 = vpop.eup %827 }
 0x3b9   :  { %v637_v60 = vmul.f32 %v828_v59, %v824_v55 }
 0x3bb   :  { %639 = vst [vmem:[%s1089_s7] sm:$0xff] %v637_v60 }
 0x3bc   :  { %v830_v61 = vpop.eup %829 }
 0x3bd   :  { %v638_v62 = vmul.f32 %v830_v61, %v826_v56 }
 0x3bf   :  { %640 = vst [vmem:[%s1089_s7 + $0x8] sm:$0xff] %v638_v62 }

</bundles_post_ra>
